<compile_context>
chip_gen: v6e
topology: v6e:2x2x1
jax: 0.10.0
libtpu: 0.0.40
codegen_flags: <defaults>
</compile_context>

<pallas_src>
import jax
import jax.numpy as jnp
from jax.experimental import pallas as pl
from jax.experimental.pallas import tpu as pltpu


def _add_pos_kernel(emb_ref, pos_ref, out_ref):
    # emb_ref / out_ref: (tb, tf) tile of the flattened embeddings
    # pos_ref:           (1, tf)  tile of the flattened position embeddings
    out_ref[...] = emb_ref[...] + pos_ref[...]


def _cdiv(a: int, b: int) -> int:
    return -(-a // b)


def _plan_tiles(B: int, F: int, itemsize: int,
                *, target_bytes: int = 8 << 20, min_steps: int = 4):
    """Pick (tb, tf) block sizes for a grid of (cdiv(F, tf), cdiv(B, tb)) steps."""
    sub = max(8, 32 // itemsize)           # sublane packing: f32->8, bf16->16, int8->32
    row_bytes = F * itemsize

    # Tiny problem: one block; extra grid steps would be pure overhead.
    if B * row_bytes <= (512 << 10):
        return B, F

    # Preferred plan: batch-only tiling (full lane-dense rows, pos fully resident).
    tb = min(max(1, target_bytes // max(row_bytes, 1)),   # per-block byte budget
             max(1, B // min_steps))                      # >= min_steps grid steps
    tb = (tb // sub) * sub                                 # dtype-native sublane multiple
    if tb >= sub:
        return min(tb, B), F

    # Fallback: tile the flattened feature axis too.  Hit when B is too small
    # for >= min_steps batch blocks, or when a single sublane-group of rows
    # already exceeds the block budget (huge S*H) -- restores pipelining and
    # bounds block size independently of row length.
    tb = B if B <= sub else sub
    nb = _cdiv(B, tb)
    tf_budget = max(128, (target_bytes // max(tb * itemsize, 1)) // 128 * 128)
    need_f = _cdiv(min_steps, nb)
    tf_steps = F if need_f <= 1 else max(128, (F // need_f) // 128 * 128)
    tf = min(tf_budget, tf_steps)
    if tf >= F:
        tf = F
    return tb, tf


def _vmem_limit_bytes(block_bytes: int, pos_block_bytes: int) -> int:
    # Double-buffered emb-in and out blocks + double-buffered pos tile + slack.
    # TODO(synk): pipeline_mode=pl.Buffered(1) on the pos spec would reclaim one
    # standby pos buffer; kept default-buffered here and accounted for instead.
    need = 4 * block_bytes + 2 * pos_block_bytes + (2 << 20)
    try:
        phys = int(getattr(pltpu.get_tpu_info(), "vmem_capacity_bytes", 64 << 20))
    except Exception:  # defensive: interpret mode / older runtimes
        phys = 64 << 20
    # 64-MiB-VMEM parts (v7x): cap at 40 MiB to leave Mosaic headroom;
    # 128-MiB parts (v5e/v6e): allow up to 96 MiB.
    cap = (40 << 20) if phys <= (64 << 20) else (96 << 20)
    return int(min(max(need, 16 << 20), cap))


def vit_position_embeddings(embeddings: jax.Array,
                            position_embeddings: jax.Array) -> jax.Array:
    """embeddings: (B, S, H); position_embeddings: (1, S, H) -> (B, S, H)."""
    B, S, H = embeddings.shape
    assert position_embeddings.shape == (1, S, H)
    F = S * H
    itemsize = jnp.dtype(embeddings.dtype).itemsize

    # Flatten (S, H) -> F: lane-dense blocks, full-dim exemption on F.
    emb2 = embeddings.reshape(B, F)
    pos2 = position_embeddings.reshape(1, F).astype(embeddings.dtype)

    tb, tf = _plan_tiles(B, F, itemsize)
    grid = (pl.cdiv(F, tf), pl.cdiv(B, tb))   # F slow, batch fast -> pos read once

    block_bytes = tb * tf * itemsize
    vmem_limit = _vmem_limit_bytes(block_bytes, tf * itemsize)

    cost = pl.CostEstimate(
        flops=B * F,
        transcendentals=0,
        bytes_accessed=(2 * B * F + F) * itemsize,
    )

    out2 = pl.pallas_call(
        _add_pos_kernel,
        out_shape=jax.ShapeDtypeStruct((B, F), embeddings.dtype),
        grid=grid,
        in_specs=[
            # (tb, tf) tile of the embeddings: streamed, ~MB-scale DMA per step.
            pl.BlockSpec((tb, tf), lambda f, b: (b, f)),
            # (1, tf) tile of pos: block index changes only with the slow axis,
            # so it stays VMEM-resident across the inner batch loop.
            pl.BlockSpec((1, tf), lambda f, b: (0, f)),
        ],
        out_specs=pl.BlockSpec((tb, tf), lambda f, b: (b, f)),
        compiler_params=pltpu.CompilerParams(
            dimension_semantics=("parallel", "parallel"),
            vmem_limit_bytes=vmem_limit,
        ),
        cost_estimate=cost,
    )(emb2, pos2)

    return out2.reshape(B, S, H)


if __name__ == "__main__":
    # Small shapes consistent with the module's forward:
    #   batch=2, seq=8 (num_patches+1), hidden=32
    B, S, H = 2, 8, 32
    key = jax.random.PRNGKey(0)
    k_emb, k_pos = jax.random.split(key)

    embeddings = jax.random.normal(k_emb, (B, S, H), dtype=jnp.float32)
    # Deterministically-initialized "parameter" (nn.Parameter of shape (1, S, H)).
    position_embeddings = jax.random.normal(k_pos, (1, S, H), dtype=jnp.float32) * 0.02

    out = jax.block_until_ready(vit_position_embeddings(embeddings, position_embeddings))
    ref = embeddings + position_embeddings
    assert out.shape == (B, S, H)
    assert jnp.allclose(out, ref, atol=1e-6), "mismatch vs reference (small shape)"

    # Secondary correctness check that exercises the multi-step (F-tiled) path.
    B2, S2, H2 = 2, 128, 1024
    k1, k2 = jax.random.split(jax.random.PRNGKey(1))
    emb_big = jax.random.normal(k1, (B2, S2, H2), dtype=jnp.float32)
    pos_big = jax.random.normal(k2, (1, S2, H2), dtype=jnp.float32) * 0.02
    out_big = jax.block_until_ready(vit_position_embeddings(emb_big, pos_big))
    assert jnp.allclose(out_big, emb_big + pos_big, atol=1e-6), "mismatch vs reference (tiled shape)"

    print("KERNEL_OK")
</pallas_src>

<mosaic_0001>
module attributes {stable_mosaic.version = 11 : i64} {
  func.func @_add_pos_kernel(%arg0: i32, %arg1: i32, %arg2: memref<2x256xf32, #tpu.memory_space<vmem>>, %arg3: memref<1x256xf32, #tpu.memory_space<vmem>>, %arg4: memref<2x256xf32, #tpu.memory_space<vmem>>) attributes {dimension_semantics = [#tpu.dimension_semantics<parallel>, #tpu.dimension_semantics<parallel>], iteration_bounds = array<i64: 1, 1>, scalar_prefetch = 0 : i64, scratch_operands = 0 : i64, tpu.core_type = #tpu.core_type<tc>, window_params = [{transform_indices = @transform_0, window_bounds = array<i64: 2, 256>}, {transform_indices = @transform_1, window_bounds = array<i64: 1, 256>}, {transform_indices = @transform_2, window_bounds = array<i64: 2, 256>}]} {
    %c0 = arith.constant 0 : index
    %c0_0 = arith.constant 0 : index
    %0 = vector.load %arg2[%c0, %c0_0] : memref<2x256xf32, #tpu.memory_space<vmem>>, vector<2x256xf32>
    %c0_1 = arith.constant 0 : index
    %c0_2 = arith.constant 0 : index
    %1 = vector.load %arg3[%c0_1, %c0_2] : memref<1x256xf32, #tpu.memory_space<vmem>>, vector<1x256xf32>
    %2 = vector.broadcast %1 : vector<1x256xf32> to vector<2x256xf32>
    %3 = arith.addf %0, %2 : vector<2x256xf32>
    %c0_3 = arith.constant 0 : index
    %c0_4 = arith.constant 0 : index
    %4 = vector.load %arg4[%c0_3, %c0_4] : memref<2x256xf32, #tpu.memory_space<vmem>>, vector<2x256xf32>
    tpu.vector_store %arg4[%c0_3, %c0_4], %3 {strides = array<i32>} : memref<2x256xf32, #tpu.memory_space<vmem>>, vector<2x256xf32>,
    return
  }
  func.func @transform_0(%arg0: i32, %arg1: i32) -> (i32, i32) {
    %c0_i32 = arith.constant 0 : i32
    return %arg1, %arg0 : i32, i32
  }
  func.func @transform_1(%arg0: i32, %arg1: i32) -> (i32, i32) {
    %c0_i32 = arith.constant 0 : i32
    %c0_i32_0 = arith.constant 0 : i32
    return %c0_i32, %arg0 : i32, i32
  }
  func.func @transform_2(%arg0: i32, %arg1: i32) -> (i32, i32) {
    %c0_i32 = arith.constant 0 : i32
    return %arg1, %arg0 : i32, i32
  }
}

</mosaic_0001>

<bundles_post_ra>
// kernel: tpu_custom_call.1
= control target key start
LH: loop header
LB: loop body
LE: loop exit
PB: predicated region body
PF: predicated region fallthrough
CT: control target
= control target key end

     0   :  { %7 = vsyncpa [#allocation3], 0  ;;  %s172_s0 = inlined_call_operand.hbm [shape: f32[2,256], index: 0, kind: input, shape index: {}]   ;;  %s173_s1 = inlined_call_operand.hbm [shape: f32[1,256], index: 1, kind: input, shape index: {}]   ;;  %s174_s2 = inlined_call_operand.hbm [shape: f32[2,256], index: 2, kind: output, shape index: {}]  }
   0x1   :  { %8 = vsyncpa [#allocation6], 0 }
   0x2   :  { %9 = vsyncpa [#allocation4], 0  ;;  %s144_s9 = smov [#allocation2]   ;;  %s145_s11 = smov [#allocation5]  }
   0x3   :  { %s16_s10 = sshll.u32 %s144_s9, 4  ;;  %s26_s12 = sshll.u32 %s145_s11, 4  ;;  %s17_s10 = int_to_ptr.vmem [resolvable:$true] %s16_s10  ;;  %s27_s12 = int_to_ptr.vmem [resolvable:$true] %s26_s12 }
   0x4   :  { %s86_s13 = scalar_lea.vmem %s17_s10, 64  ;;  %p91_p1 = scmp.lt.s32.totalorder %s17_s10, %s17_s10 }
   0x5   :  { %p87_p0 = scmp.ne.s32.totalorder %s17_s10, %s86_s13  ;;  %p92_p2 = scmp.lt.s32.totalorder %s86_s13, %s86_s13 }
   0x7   :  { %p93_p3 = por %p92_p2, %p91_p1 }
   0x9   :  { %p94_p4 = pnand %p93_p3, %p87_p0 }
   0xb   :  { %97 = shalt.err (!%p94_p4)
}
   0xc   :  { %19 = dma.hbm_to_vmem [thread:$0]  %s172_s0, 64, %s17_s10, [#allocation3]  }
   0xd   :  { %s106_s16 = scalar_lea.vmem %s27_s12, 32  ;;  %p111_p6 = scmp.lt.s32.totalorder %s27_s12, %s27_s12 }
   0xe   :  { %p107_p5 = scmp.ne.s32.totalorder %s27_s12, %s106_s16  ;;  %p112_p7 = scmp.lt.s32.totalorder %s106_s16, %s106_s16 }
  0x10   :  { %p113_p8 = por %p112_p7, %p111_p6 }
  0x12   :  { %p114_p9 = pnand %p113_p8, %p107_p5 }
  0x14   :  { %117 = shalt.err (!%p114_p9)
}
  0x15   :  { %29 = dma.hbm_to_vmem [thread:$0]  %s173_s1, 32, %s27_s12, [#allocation6]  }
  0x16   :  { %138 = dma.done.wait [#allocation3], 64  }
  0x17   :  { %139 = vsyncadd [#allocation3], 4294967232 }
  0x18   :  { %140 = dma.done.wait [#allocation6], 32  }
  0x19   :  { %141 = vsyncadd [#allocation6], 4294967264  ;;  %v39_v0 = vlaneseq  ;;  %v146_v1 = vmov 1983009808   ;;  %v37_v7 = vld [vmem:[#allocation5] sm:$0x3] }
  0x1a   :  { %v49_v2 = vunpack.c.l.s4 %v146_v1  ;;  %v36_v12 = vld [vmem:[#allocation2] sm:$0xf]  ;;  %s147_s0 = smov [#allocation7]  }
  0x1b   :  { %v40_v3 = vshrl.u32 %v39_v0, 7  ;;  %s64_s19 = sshll.u32 %s147_s0, 4  ;;  %s65_s19 = int_to_ptr.vmem [resolvable:$true] %s64_s19 }
  0x1c   :  { %v50_v6 = vunpack.c.0.s8 %v49_v2  ;;  %s118_s1 = scalar_lea.vmem %s65_s19, 64  ;;  %p123_p11 = scmp.lt.s32.totalorder %s65_s19, %s65_s19 }
  0x1d   :  { %v41_v4 = vsub.s32 0, %v40_v3  ;;  %v45_v5 = vsub.s32 1, %v40_v3  ;;  %p119_p10 = scmp.ne.s32.totalorder %s65_s19, %s118_s1  ;;  %p124_p12 = scmp.lt.s32.totalorder %s118_s1, %s118_s1 }
  0x1e   :  { %v53_v10 = vsub.s32 %v50_v6, %v40_v3 }
  0x1f   :  { %v42_v8 = vrot.slane %v37_v7, %v41_v4  ;;  %v46_v9 = vrot.slane %v37_v7, %v45_v5  ;;  %p125_p13 = por %p124_p12, %p123_p11 }
  0x21   :  { %v47_v11 = vcombine.low %v42_v8, %v46_v9  ;;  %p126_p0 = pnand %p125_p13, %p119_p10 }
  0x23   :  { %v54_v13 = vrot.slane %v47_v11, %v53_v10 }
  0x25   :  { %v56_v14 = vadd.f32 %v54_v13, %v36_v12 }
  0x27   :  { %57 = vst [vmem:[#allocation7] sm:$0xf] %v56_v14 }
  0x28   :  { %129 = shalt.err (!%p126_p0)
}
  0x29   :  { %67 = dma.vmem_to_hbm [thread:$0]  %s65_s19, 64, %s174_s2, [#allocation4]  }
  0x2a   :  { %142 = dma.done.wait [#allocation4], 64  }
  0x2b   :  { %143 = vsyncadd [#allocation4], 4294967232 }
  0x2c   :  { %71 = vsyncpa [#allocation3], 1 }
  0x2d   :  { %72 = vsyncpa [#allocation6], 1 }
  0x2e   :  { %73 = vsyncpa [#allocation4], 1 }

</bundles_post_ra>
